<compile_context>
chip_gen: v6e
topology: v6e:2x2x1
jax: 0.10.0
libtpu: 0.0.40
codegen_flags: <defaults>
</compile_context>

<pallas_src>
from functools import partial

import jax
import jax.numpy as jnp
from jax import lax
from jax.experimental import pallas as pl
from jax.experimental.pallas import tpu as pltpu


def _fmix32(x):
    # murmur3 finalizer on uint32: cheap avalanche, good enough for a dropout mask.
    x = x ^ (x >> 16)
    x = x * jnp.uint32(0x85EBCA6B)
    x = x ^ (x >> 13)
    x = x * jnp.uint32(0xC2B2AE35)
    x = x ^ (x >> 16)
    return x


def lrg_kernel(seed_ref, x_ref, w1_ref, b1_ref, w2_ref, b2_ref, w3_ref, b3_ref,
               o_ref, *, lambda1):
    x = x_ref[0]                                                    # (E, Lt), lanes = L

    # ---- align_layer: 1x1 Conv1d == (T,E) @ (E,Lt) + bias ----
    h = jnp.dot(w1_ref[...], x, preferred_element_type=jnp.float32) + b1_ref[...]

    # ---- random mask over the conv output (requires embed_dim == text_dim, as in torch) ----
    T, Lt = h.shape
    b_idx = pl.program_id(0)
    l_start = pl.program_id(1) * Lt
    l_total = pl.num_programs(1) * Lt
    row = lax.broadcasted_iota(jnp.int32, h.shape, 0)               # channel index
    col = lax.broadcasted_iota(jnp.int32, h.shape, 1)               # local L index
    gidx = (b_idx * l_total + l_start + col) * T + row              # unique per element
    bits = gidx.astype(jnp.uint32) * jnp.uint32(0x9E3779B1)
    bits = bits ^ (seed_ref[0].astype(jnp.uint32) * jnp.uint32(0x85EBCA77))
    bits = _fmix32(bits)
    thr = jnp.uint32(min(max(int(float(lambda1) * (2 ** 32)), 0), 2 ** 32 - 1))
    h = jnp.where(bits >= thr, h, jnp.float32(0.0))                 # keep prob = 1 - lambda1

    # ---- generative_linear: conv -> relu -> conv ----
    h = jnp.dot(w2_ref[...], h, preferred_element_type=jnp.float32) + b2_ref[...]
    h = jnp.maximum(h, 0.0)
    h = jnp.dot(w3_ref[...], h, preferred_element_type=jnp.float32) + b3_ref[...]

    o_ref[0] = h.astype(o_ref.dtype)


def init_params(key, embed_dim, text_dim):
    k1, k2, k3, k4, k5, k6 = jax.random.split(key, 6)
    s1 = 1.0 / jnp.sqrt(embed_dim)
    s2 = 1.0 / jnp.sqrt(text_dim)
    # torch Conv1d weight (out, in, 1) stored here as (out, in); bias as (out, 1).
    return dict(
        w1=jax.random.uniform(k1, (text_dim, embed_dim), jnp.float32, -s1, s1),
        b1=jax.random.uniform(k2, (text_dim, 1), jnp.float32, -s1, s1),
        w2=jax.random.uniform(k3, (text_dim, text_dim), jnp.float32, -s2, s2),
        b2=jax.random.uniform(k4, (text_dim, 1), jnp.float32, -s2, s2),
        w3=jax.random.uniform(k5, (text_dim, text_dim), jnp.float32, -s2, s2),
        b3=jax.random.uniform(k6, (text_dim, 1), jnp.float32, -s2, s2),
    )


def _pick_l_tile(L, max_tile=512):
    # Lane-dim tile: multiple of 128 (or full extent) to satisfy the (8,128) rule
    # and keep stores lane-dense; ~512 lanes x 32 ch x 4B stays far under VMEM
    # budgets on v5e/v6e/v7x even with double-buffering.
    if L % 128 != 0 or L <= max_tile:
        return L
    for t in range(max_tile, 127, -128):
        if L % t == 0:
            return t
    return 128  # ragged last block handled by Pallas


def lrg_layer_forward(x_ncl, params, lambda1, seed):
    """x_ncl: (B, embed_dim, L) float32 — same NCL layout as the PyTorch module."""
    B, E, L = x_ncl.shape
    T = params["w1"].shape[0]
    tile_l = _pick_l_tile(L)
    grid = (B, pl.cdiv(L, tile_l))
    seed_arr = jnp.asarray([seed], dtype=jnp.int32)

    flops = 2 * B * L * (E * T + 2 * T * T)
    bytes_accessed = 4 * (B * E * L + B * T * L + E * T + 2 * T * T + 3 * T)
    full = lambda b, l: (0, 0)

    return pl.pallas_call(
        partial(lrg_kernel, lambda1=float(lambda1)),
        out_shape=jax.ShapeDtypeStruct((B, T, L), jnp.float32),
        grid=grid,
        in_specs=[
            pl.BlockSpec(memory_space=pltpu.MemorySpace.SMEM),        # seed scalar
            pl.BlockSpec((1, E, tile_l), lambda b, l: (b, 0, l)),     # x  (NCL)
            pl.BlockSpec((T, E), full),                               # w1 (resident)
            pl.BlockSpec((T, 1), full),                               # b1
            pl.BlockSpec((T, T), full),                               # w2
            pl.BlockSpec((T, 1), full),                               # b2
            pl.BlockSpec((T, T), full),                               # w3
            pl.BlockSpec((T, 1), full),                               # b3
        ],
        out_specs=pl.BlockSpec((1, T, tile_l), lambda b, l: (b, 0, l)),
        compiler_params=pltpu.CompilerParams(
            dimension_semantics=("parallel", "parallel")),
        cost_estimate=pl.CostEstimate(
            flops=flops, transcendentals=0, bytes_accessed=bytes_accessed),
    )(seed_arr, x_ncl, params["w1"], params["b1"], params["w2"], params["b2"],
      params["w3"], params["b3"])


def _reference_nomask(x_ncl, params):
    # Pure-JAX reference for lambda1 == 0 (mask keeps everything).
    h = jnp.einsum("te,bel->btl", params["w1"], x_ncl) + params["b1"][None]
    h = jnp.einsum("ts,bsl->btl", params["w2"], h) + params["b2"][None]
    h = jnp.maximum(h, 0.0)
    h = jnp.einsum("ts,bsl->btl", params["w3"], h) + params["b3"][None]
    return h


if __name__ == "__main__":
    # embed_dim == text_dim (required by the PyTorch module's mask broadcast)
    B, E, T, L = 2, 32, 32, 1024
    lambda1 = 0.5

    key = jax.random.PRNGKey(0)
    kx, kp = jax.random.split(key)
    x = jax.random.normal(kx, (B, E, L), dtype=jnp.float32)
    params = init_params(kp, E, T)

    # Deterministic correctness check: lambda1 = 0 keeps every element, so the
    # kernel must match the plain conv->mask(all-ones)->conv->relu->conv pipeline.
    out_nomask = jax.block_until_ready(lrg_layer_forward(x, params, 0.0, seed=0))
    ref = jax.block_until_ready(_reference_nomask(x, params))
    assert out_nomask.shape == (B, T, L), out_nomask.shape
    assert bool(jnp.allclose(out_nomask, ref, rtol=1e-2, atol=1e-2))

    # Stochastic forward, matching the module's semantics (keep prob = 1 - lambda1).
    out = jax.block_until_ready(lrg_layer_forward(x, params, lambda1, seed=1234))
    assert out.shape == (B, T, L), out.shape
    assert bool(jnp.all(jnp.isfinite(out)))
    print("KERNEL_OK")
</pallas_src>

<mosaic_0001>
module attributes {stable_mosaic.version = 11 : i64} {
  func.func @lrg_kernel(%arg0: i32, %arg1: i32, %arg2: memref<1xi32, #tpu.memory_space<smem>>, %arg3: memref<1x32x512xf32, #tpu.memory_space<vmem>>, %arg4: memref<32x32xf32, #tpu.memory_space<vmem>>, %arg5: memref<32x1xf32, #tpu.memory_space<vmem>>, %arg6: memref<32x32xf32, #tpu.memory_space<vmem>>, %arg7: memref<32x1xf32, #tpu.memory_space<vmem>>, %arg8: memref<32x32xf32, #tpu.memory_space<vmem>>, %arg9: memref<32x1xf32, #tpu.memory_space<vmem>>, %arg10: memref<1x32x512xf32, #tpu.memory_space<vmem>>) attributes {dimension_semantics = [#tpu.dimension_semantics<parallel>, #tpu.dimension_semantics<parallel>], iteration_bounds = array<i64: 2, 2>, scalar_prefetch = 0 : i64, scratch_operands = 0 : i64, tpu.core_type = #tpu.core_type<tc>, window_params = [{transform_indices = @transform_0, window_bounds = array<i64: 1>}, {transform_indices = @transform_1, window_bounds = array<i64: 1, 32, 512>}, {pipeline_mode = #tpu.pipeline_mode<synchronous>, transform_indices = @transform_2, window_bounds = array<i64: 32, 32>}, {pipeline_mode = #tpu.pipeline_mode<synchronous>, transform_indices = @transform_3, window_bounds = array<i64: 32, 1>}, {pipeline_mode = #tpu.pipeline_mode<synchronous>, transform_indices = @transform_4, window_bounds = array<i64: 32, 32>}, {pipeline_mode = #tpu.pipeline_mode<synchronous>, transform_indices = @transform_5, window_bounds = array<i64: 32, 1>}, {pipeline_mode = #tpu.pipeline_mode<synchronous>, transform_indices = @transform_6, window_bounds = array<i64: 32, 32>}, {pipeline_mode = #tpu.pipeline_mode<synchronous>, transform_indices = @transform_7, window_bounds = array<i64: 32, 1>}, {transform_indices = @transform_8, window_bounds = array<i64: 1, 32, 512>}]} {
    %c0 = arith.constant 0 : index
    %c0_0 = arith.constant 0 : index
    %c0_1 = arith.constant 0 : index
    %0 = vector.load %arg3[%c0, %c0_0, %c0_1] : memref<1x32x512xf32, #tpu.memory_space<vmem>>, vector<1x32x512xf32>
    %1 = vector.shape_cast %0 : vector<1x32x512xf32> to vector<32x512xf32>
    %c0_2 = arith.constant 0 : index
    %c0_3 = arith.constant 0 : index
    %2 = vector.load %arg4[%c0_2, %c0_3] : memref<32x32xf32, #tpu.memory_space<vmem>>, vector<32x32xf32>
    %cst = arith.constant dense<0.000000e+00> : vector<32x512xf32>
    %3 = tpu.matmul %2, %1, %cst {dimension_numbers = #tpu.dot_dimension_numbers<[1], [0], [0], [1], [0, 0, 1, 1], [], []>} : vector<32x32xf32>, vector<32x512xf32>, vector<32x512xf32> -> vector<32x512xf32>
    %c0_4 = arith.constant 0 : index
    %c0_5 = arith.constant 0 : index
    %4 = vector.load %arg5[%c0_4, %c0_5] : memref<32x1xf32, #tpu.memory_space<vmem>>, vector<32x1xf32>
    %5 = vector.broadcast %4 : vector<32x1xf32> to vector<32x512xf32>
    %6 = arith.addf %3, %5 : vector<32x512xf32>
    %c512_i32 = arith.constant 512 : i32
    %7 = arith.muli %arg1, %c512_i32 : i32
    %8 = tpu.iota {dimensions = array<i32: 0>} : vector<32x512xi32>
    %9 = tpu.iota {dimensions = array<i32: 1>} : vector<32x512xi32>
    %c1024_i32 = arith.constant 1024 : i32
    %10 = arith.muli %arg0, %c1024_i32 : i32
    %11 = arith.addi %10, %7 : i32
    %12 = vector.broadcast %11 : i32 to vector<32x512xi32>
    %13 = arith.addi %12, %9 : vector<32x512xi32>
    %c32_i32 = arith.constant 32 : i32
    %14 = vector.broadcast %c32_i32 : i32 to vector<32x512xi32>
    %15 = arith.muli %13, %14 : vector<32x512xi32>
    %16 = arith.addi %15, %8 : vector<32x512xi32>
    %c-1640531535_i32 = arith.constant -1640531535 : i32
    %17 = vector.broadcast %c-1640531535_i32 : i32 to vector<32x512xi32>
    %18 = arith.muli %16, %17 : vector<32x512xi32>
    %c0_6 = arith.constant 0 : index
    %19 = memref.load %arg2[%c0_6] : memref<1xi32, #tpu.memory_space<smem>>
    %c-2048144777_i32 = arith.constant -2048144777 : i32
    %20 = arith.muli %19, %c-2048144777_i32 : i32
    %21 = vector.broadcast %20 : i32 to vector<32x512xi32>
    %22 = arith.xori %18, %21 : vector<32x512xi32>
    %c16_i32 = arith.constant 16 : i32
    %23 = vector.broadcast %c16_i32 : i32 to vector<32x512xi32>
    %24 = arith.shrui %22, %23 : vector<32x512xi32>
    %25 = arith.xori %22, %24 : vector<32x512xi32>
    %c-2048144789_i32 = arith.constant -2048144789 : i32
    %26 = vector.broadcast %c-2048144789_i32 : i32 to vector<32x512xi32>
    %27 = arith.muli %25, %26 : vector<32x512xi32>
    %c13_i32 = arith.constant 13 : i32
    %28 = vector.broadcast %c13_i32 : i32 to vector<32x512xi32>
    %29 = arith.shrui %27, %28 : vector<32x512xi32>
    %30 = arith.xori %27, %29 : vector<32x512xi32>
    %c-1028477387_i32 = arith.constant -1028477387 : i32
    %31 = vector.broadcast %c-1028477387_i32 : i32 to vector<32x512xi32>
    %32 = arith.muli %30, %31 : vector<32x512xi32>
    %c16_i32_7 = arith.constant 16 : i32
    %33 = vector.broadcast %c16_i32_7 : i32 to vector<32x512xi32>
    %34 = arith.shrui %32, %33 : vector<32x512xi32>
    %35 = arith.xori %32, %34 : vector<32x512xi32>
    %c0_i32 = arith.constant 0 : i32
    %36 = vector.broadcast %c0_i32 : i32 to vector<32x512xi32>
    %37 = arith.cmpi uge, %35, %36 : vector<32x512xi32>
    %cst_8 = arith.constant 0.000000e+00 : f32
    %38 = vector.broadcast %cst_8 : f32 to vector<32x512xf32>
    %39 = arith.select %37, %6, %38 : vector<32x512xi1>, vector<32x512xf32>
    %c0_9 = arith.constant 0 : index
    %c0_10 = arith.constant 0 : index
    %40 = vector.load %arg6[%c0_9, %c0_10] : memref<32x32xf32, #tpu.memory_space<vmem>>, vector<32x32xf32>
    %cst_11 = arith.constant dense<0.000000e+00> : vector<32x512xf32>
    %41 = tpu.matmul %40, %39, %cst_11 {dimension_numbers = #tpu.dot_dimension_numbers<[1], [0], [0], [1], [0, 0, 1, 1], [], []>} : vector<32x32xf32>, vector<32x512xf32>, vector<32x512xf32> -> vector<32x512xf32>
    %c0_12 = arith.constant 0 : index
    %c0_13 = arith.constant 0 : index
    %42 = vector.load %arg7[%c0_12, %c0_13] : memref<32x1xf32, #tpu.memory_space<vmem>>, vector<32x1xf32>
    %43 = vector.broadcast %42 : vector<32x1xf32> to vector<32x512xf32>
    %44 = arith.addf %41, %43 : vector<32x512xf32>
    %cst_14 = arith.constant 0.000000e+00 : f32
    %45 = vector.broadcast %cst_14 : f32 to vector<32x512xf32>
    %46 = arith.maximumf %44, %45 : vector<32x512xf32>
    %c0_15 = arith.constant 0 : index
    %c0_16 = arith.constant 0 : index
    %47 = vector.load %arg8[%c0_15, %c0_16] : memref<32x32xf32, #tpu.memory_space<vmem>>, vector<32x32xf32>
    %cst_17 = arith.constant dense<0.000000e+00> : vector<32x512xf32>
    %48 = tpu.matmul %47, %46, %cst_17 {dimension_numbers = #tpu.dot_dimension_numbers<[1], [0], [0], [1], [0, 0, 1, 1], [], []>} : vector<32x32xf32>, vector<32x512xf32>, vector<32x512xf32> -> vector<32x512xf32>
    %c0_18 = arith.constant 0 : index
    %c0_19 = arith.constant 0 : index
    %49 = vector.load %arg9[%c0_18, %c0_19] : memref<32x1xf32, #tpu.memory_space<vmem>>, vector<32x1xf32>
    %50 = vector.broadcast %49 : vector<32x1xf32> to vector<32x512xf32>
    %51 = arith.addf %48, %50 : vector<32x512xf32>
    %c0_20 = arith.constant 0 : index
    %c0_21 = arith.constant 0 : index
    %c0_22 = arith.constant 0 : index
    %52 = vector.load %arg10[%c0_20, %c0_21, %c0_22] : memref<1x32x512xf32, #tpu.memory_space<vmem>>, vector<1x32x512xf32>
    %53 = vector.shape_cast %52 : vector<1x32x512xf32> to vector<32x512xf32>
    %54 = vector.shape_cast %51 : vector<32x512xf32> to vector<1x32x512xf32>
    tpu.vector_store %arg10[%c0_20, %c0_21, %c0_22], %54 {strides = array<i32>} : memref<1x32x512xf32, #tpu.memory_space<vmem>>, vector<1x32x512xf32>,
    return
  }
  func.func @transform_0(%arg0: i32, %arg1: i32) -> i32 {
    %c0_i32 = arith.constant 0 : i32
    %c0_i32_0 = arith.constant 0 : i32
    return %c0_i32 : i32
  }
  func.func @transform_1(%arg0: i32, %arg1: i32) -> (i32, i32, i32) {
    %c0_i32 = arith.constant 0 : i32
    %c0_i32_0 = arith.constant 0 : i32
    return %arg0, %c0_i32, %arg1 : i32, i32, i32
  }
  func.func @transform_2(%arg0: i32, %arg1: i32) -> (i32, i32) {
    %c0_i32 = arith.constant 0 : i32
    %c0_i32_0 = arith.constant 0 : i32
    %c0_i32_1 = arith.constant 0 : i32
    return %c0_i32, %c0_i32_0 : i32, i32
  }
  func.func @transform_3(%arg0: i32, %arg1: i32) -> (i32, i32) {
    %c0_i32 = arith.constant 0 : i32
    %c0_i32_0 = arith.constant 0 : i32
    %c0_i32_1 = arith.constant 0 : i32
    return %c0_i32, %c0_i32_0 : i32, i32
  }
  func.func @transform_4(%arg0: i32, %arg1: i32) -> (i32, i32) {
    %c0_i32 = arith.constant 0 : i32
    %c0_i32_0 = arith.constant 0 : i32
    %c0_i32_1 = arith.constant 0 : i32
    return %c0_i32, %c0_i32_0 : i32, i32
  }
  func.func @transform_5(%arg0: i32, %arg1: i32) -> (i32, i32) {
    %c0_i32 = arith.constant 0 : i32
    %c0_i32_0 = arith.constant 0 : i32
    %c0_i32_1 = arith.constant 0 : i32
    return %c0_i32, %c0_i32_0 : i32, i32
  }
  func.func @transform_6(%arg0: i32, %arg1: i32) -> (i32, i32) {
    %c0_i32 = arith.constant 0 : i32
    %c0_i32_0 = arith.constant 0 : i32
    %c0_i32_1 = arith.constant 0 : i32
    return %c0_i32, %c0_i32_0 : i32, i32
  }
  func.func @transform_7(%arg0: i32, %arg1: i32) -> (i32, i32) {
    %c0_i32 = arith.constant 0 : i32
    %c0_i32_0 = arith.constant 0 : i32
    %c0_i32_1 = arith.constant 0 : i32
    return %c0_i32, %c0_i32_0 : i32, i32
  }
  func.func @transform_8(%arg0: i32, %arg1: i32) -> (i32, i32, i32) {
    %c0_i32 = arith.constant 0 : i32
    %c0_i32_0 = arith.constant 0 : i32
    return %arg0, %c0_i32, %arg1 : i32, i32, i32
  }
}

</mosaic_0001>

<bundles_post_ra>
// kernel: tpu_custom_call.1
= control target key start
LH: loop header
LB: loop body
LE: loop exit
PB: predicated region body
PF: predicated region fallthrough
CT: control target
= control target key end

     0   :  { %s2094_s0 = inlined_call_operand.<no memory space> [shape: s32[1], index: 0, kind: input, shape index: {}]   ;;  %s2095_s1 = inlined_call_operand.hbm [shape: f32[2,32,1024], index: 1, kind: input, shape index: {}]   ;;  %s2096_s2 = inlined_call_operand.vmem [shape: f32[32,32], index: 2, kind: input, shape index: {}]   ;;  %s2097_s3 = inlined_call_operand.vmem [shape: f32[32,1], index: 3, kind: input, shape index: {}]   ;;  %s2098_s4 = inlined_call_operand.vmem [shape: f32[32,32], index: 4, kind: input, shape index: {}]   ;;  %s2099_s5 = inlined_call_operand.vmem [shape: f32[32,1], index: 5, kind: input, shape index: {}]   ;;  %s2100_s6 = inlined_call_operand.vmem [shape: f32[32,32], index: 6, kind: input, shape index: {}]   ;;  %s2101_s7 = inlined_call_operand.vmem [shape: f32[32,1], index: 7, kind: input, shape index: {}]   ;;  %s2102_s8 = inlined_call_operand.hbm [shape: f32[2,32,1024], index: 8, kind: output, shape index: {}]  }
   0x1   :  { %2110 = sst [smem:[#allocation14_spill]] %s2102_s8 }
   0x2   :  { %13 = sst [smem:[#allocation2]] %s2094_s0 }
   0x3   :  { %14 = vsyncpa [#allocation4], 0 }
   0x4   :  { %16 = vsyncpa [#allocation4 + $0x1], 0 }
   0x5   :  { %17 = vsyncpa [#allocation5], 0 }
   0x6   :  { %19 = vsyncpa [#allocation5 + $0x1], 0  ;;  %s1718_s29 = smov 0   ;;  %s1720_s30 = smov 0  }
   0x7   :  { %s1722_s9 = smov 0   ;;  %s1724_s10 = smov 0  }
   0x8   :  { %s1726_s11 = smov 0   ;;  %s1728_s12 = smov 0  }
   0x9   :  { %s1730_s13 = smov 0   ;;  %s1732_s14 = smov 0  }
   0xa LB: > { %2111 = sst [smem:[#allocation9_spill]] %s1630_s29  ;;  %s1387_s0 = sadd.s32 4294967295, %s1658_s14   ;;  %s1658_s14 = sphi %s1732_s14, %s25_s14   ;;  %s1654_s13 = sphi %s1730_s13, %s2126_s13   ;;  %s1650_s12 = sphi %s1728_s12, %s2131_s12   ;;  %s1646_s11 = sphi %s1726_s11, %s2124_s11   ;;  %s1642_s10 = sphi %s1724_s10, %s2130_s10   ;;  %s1638_s9 = sphi %s1722_s9, %s2129_s9   ;;  %s1634_s30 = sphi %s1720_s30, %s2128_s30   ;;  %s1630_s29 = sphi %s1718_s29, %s2127_s29  }
   0xb   : > { %2112 = sst [smem:[#allocation10_spill]] %s1654_s13  ;;  %s1388_s15 = sadd.s32 4294967294, %s1658_s14  }
   0xc   : > { %s34_s16 = sadd.s32 1, %s1650_s12  ;;  %s37_s17 = sadd.s32 1, %s1654_s13 }
   0xd   : > { %p35_p0 = scmp.ge.s32.totalorder %s34_s16, 2  ;;  %s67_s18 = sadd.s32 1, %s1638_s9 }
   0xe   : > { %p74_p1 = scmp.ne.s32.totalorder %s1638_s9, %s1634_s30  ;;  %p75_p2 = scmp.eq.s32.totalorder %s1658_s14, 0 }
   0xf   : > { %s2133_s16 = smov (%p35_p0, %s34_s16), 0  ;;  %s2135_s17 = smov (!%p35_p0, %s37_s17), %s1654_s13 }
  0x10   : > { %2113 = sst [smem:[#allocation11_spill]] %s2133_s16  ;;  %s63_s19 = ssub.s32 %s1650_s12, %s2133_s16 }
  0x11   : > { %p1771_p3 = por %p75_p2, %p74_p1  ;;  %p39_p4 = scmp.ge.s32.totalorder %s2135_s17, 2 }
  0x12   : > { %p80_p5 = scmp.ne.s32.totalorder %s1634_s30, %s1630_s29  ;;  %p81_p6 = scmp.eq.s32.totalorder %s1387_s0, 0 }
  0x13   : > { %p232_p7 = scmp.eq.s32.totalorder %s1387_s0, 3  ;;  %s2137_s17 = smov (%p39_p4, %s2135_s17), 0 }
  0x14   : > { %2115 = sst [smem:[#allocation12_spill]] %s2137_s17  ;;  %p1779_p8 = por %p81_p6, %p80_p5 }
  0x15   : > { %p1783_p9 = por %p232_p7, %p74_p1  ;;  %s62_s23 = ssub.s32 %s1654_s13, %s2137_s17 }
  0x16   : > { %p238_p10 = scmp.eq.s32.totalorder %s1388_s15, 3  ;;  %s64_s24 = sor.u32 %s63_s19, %s62_s23 }
  0x17   : > { %s2117_s22 = scalar_select %p1783_p9, 1, 0 }
  0x18   : > { %p65_p11 = scmp.eq.s32.totalorder %s64_s24, 0  ;;  %p1789_p12 = por %p238_p10, %p80_p5 }
  0x19   : > { %2118 = sst [smem:[#allocation13_spill]] %s2117_s22  ;;  %p1458_p13 = scmp.lt.s32.totalorder %s1658_s14, 4 }
  0x1a   : > { %s279_s26 = sand.u32 1, %s1638_s9   ;;  %s1392_s0 = sshll.u32 %s1650_s12, 2 }
  0x1b   : > { %s1796_s27 = scalar_select %p65_p11, %s1638_s9, %s67_s18  }
  0x1c   : > { %s1391_s28 = sshll.u32 %s279_s26, 7  ;;  %s1393_s16 = sshll.u32 %s1654_s13, 5 }
  0x1d   : > { %s283_s29 = scalar_lea.vmem [#allocation3], %s1391_s28  ;;  %s289_s22 = sadd.s32 %s1393_s16, %s1392_s0 }
  0x1e   : > { %s292_s8 = sshll.u32 %s283_s29, 4  ;;  %s1394_s17 = sshll.u32 %s289_s22, 7  ;;  %s293_s8 = int_to_ptr.vmem [resolvable:$true] %s292_s8 }
  0x1f   : > { %p1802_p0 = pnand %p1458_p13, %p1771_p3  ;;  %s291_s24 = scalar_lea.hbm %s2095_s1, %s1394_s17 }
  0x20   : > { %p1395_p1 = scmp.ge.s32.totalorder %s1658_s14, 1  ;;  %s280_s18 = scalar_lea.sflag [#allocation4], %s279_s26 }
  0x21   : > { %p1536_p2 = pneg %p1802_p0  ;;  %s1547_s13 = scalar_lea.vmem %s293_s8, 2048 }
  0x22   : > { %p1548_p4 = scmp.ne.s32.totalorder %s293_s8, %s1547_s13  ;;  %s1660_s29 = smov [#allocation3]  }
  0x23   : > { %s1552_s16 = sshll.u32 %s1660_s29, 4  ;;  %s1553_s16 = int_to_ptr.vmem [resolvable:$false] %s1552_s16 }
  0x24   : > { %p1550_p5 = pnand %p1548_p4, %p1536_p2  ;;  %s1554_s20 = scalar_lea.vmem %s1553_s16, 4096 }
  0x25   : > { %p1555_p3 = scmp.lt.s32.totalorder %s293_s8, %s1553_s16  ;;  %p1556_p7 = scmp.lt.s32.totalorder %s1554_s20, %s1547_s13 }
  0x26   : > { %p1551_p6 = pneg %p1550_p5 }
  0x27   : > { %p1557_p10 = por %p1556_p7, %p1555_p3 }
  0x29   : > { %p1558_p11 = pnand %p1557_p10, %p1551_p6 }
  0x2b   : > { %1561 = shalt.err (!%p1558_p11)
}
  0x2c   : > { %s1661_s22 = smov 1024   ;;  %s1662_s17 = smov 512  }
  0x2d   : > { %s1663_s26 = smov 32   ;;  %p300_p13 = scmp.lt.s32.totalorder %s1658_s14, 5 }
  0x2e   : > { %1453 = dma.hbm_to_vmem [thread:$0]  (!%p1802_p0), %s291_s24, 2048, %s293_s8, %s280_s18, %s1661_s22, %s1662_s17, %s1663_s26  }
  0x2f   : > { %p301_p2 = pnand %p1395_p1, %p300_p13 }
  0x30   : > { %s1818_s28 = sand.u32 (!%p301_p2), 1, %s1634_s30  }
  0x31   : > { %304 = sbr.rel (%p301_p2) target bundleno = 726 (0x2d6), region = 52  ;;  %s1396_s13 = sshll.u32 (!%p301_p2), %s1818_s28, 7 }
  0x32   : > { %s307_s0 = scalar_lea.sflag (!%p301_p2), [#allocation4], %s1818_s28  ;;  %s1824_s19 = scalar_lea.vmem (!%p301_p2), [#allocation3], %s1396_s13 }
  0x36   : > { %1621 = dma.done.wait (%p1779_p8), %s307_s0, 2048  }
  0x37   : > { %1623 = vsyncadd (%p1779_p8), %s307_s0, 4294965248  ;;  %v1664_v0 = vmov 0.0   ;;  %v1665_v1 = vmov 0   ;;  %v358_v2 = vld [vmem:[%s1824_s19 + $0x68] sm:$0xff]  ;;  %v360_v3 = vld [vmem:[%s1824_s19 + $0x78] sm:$0xff]  ;;  %vm389_vm0 = vcmask 261120   ;;  %v581_v34 = vlaneseq }
  0x38   : > { %466 = vmatprep.mubr.f32.mxu0 %v1664_v0  ;;  %555 = vmatprep.mubr.f32.mxu1 %v1664_v0  ;;  %v357_v4 = vld [vmem:[%s1824_s19 + $0x60] sm:$0xff]  ;;  %v359_v5 = vld [vmem:[%s1824_s19 + $0x70] sm:$0xff]  ;;  %v354_v6 = vld [vmem:[%s1824_s19 + $0x48] sm:$0xff]  ;;  %s1406_s24 = sshll.u32 %s1642_s10, 9  ;;  %s1407_s18 = sshll.u32 %s1646_s11, 10 }
  0x39   : > { %1532 = vset.pattern.permute.xlu0 %v1665_v1  ;;  %1533 = vset.pattern.permute.xlu1 %v1665_v1  ;;  %v356_v7 = vld [vmem:[%s1824_s19 + $0x58] sm:$0xff]  ;;  %v353_v8 = vld [vmem:[%s1824_s19 + $0x40] sm:$0xff]  ;;  %v355_v9 = vld [vmem:[%s1824_s19 + $0x50] sm:$0xff]  ;;  %v587_v35 = vand.u32 127, %v581_v34  ;;  %s592_s29 = sadd.s32 %s1407_s18, %s1406_s24  ;;  %v582_v40 = vshrl.u32 %v581_v34, 7  ;;  %s634_s16 = sld [smem:[#allocation2]] }
  0x3a   : > { %426 = vmatprep.subr.mxu0 %v358_v2  ;;  %515 = vmatprep.subr.mxu1 %v360_v3  ;;  %v350_v10 = vld [vmem:[%s1824_s19 + $0x28] sm:$0xff]  ;;  %v352_v11 = vld [vmem:[%s1824_s19 + $0x38] sm:$0xff]  ;;  %v349_v12 = vld [vmem:[%s1824_s19 + $0x20] sm:$0xff]  ;;  %v593_v37 = vstv %s592_s29  ;;  %s2015_s26 = scalar_lea.vmem [#allocation6], %s1396_s13  ;;  %s1441_s0 = sshll.u32 %s1642_s10, 2 }
  0x3b   : > { %427 = vmatpush1.msra.mxu0 %v357_v4  ;;  %516 = vmatpush1.msra.mxu1 %v359_v5  ;;  %v351_v13 = vld [vmem:[%s1824_s19 + $0x30] sm:$0xff]  ;;  %v346_v14 = vld [vmem:[%s1824_s19 + $0x8] sm:$0xff]  ;;  %v348_v15 = vld [vmem:[%s1824_s19 + $0x18] sm:$0xff]  ;;  %v588_v36 = vadd.s32 128, %v587_v35  ;;  %v590_v38 = vadd.s32 384, %v587_v35  ;;  %v589_v39 = vadd.s32 256, %v587_v35  ;;  %v594_v43 = vadd.s32 %v593_v37, %v587_v35 }
  0x3c   : > { %428 = vmatprep.subr.mxu0 %v354_v6  ;;  %517 = vmatprep.subr.mxu1 %v356_v7  ;;  %v345_v16 = vld [vmem:[%s1824_s19] sm:$0xff]  ;;  %v347_v17 = vld [vmem:[%s1824_s19 + $0x10] sm:$0xff]  ;;  %v368_v19 = vld [vmem:[%s2097_s3 + $0x18] sm:$0xff]  ;;  %v585_v45 = vadd.s32 24, %v582_v40  ;;  %v584_v50 = vadd.s32 16, %v582_v40  ;;  %v583_v59 = vadd.s32 8, %v582_v40 }
  0x3d   : > { %429 = vmatpush1.msra.mxu0 %v353_v8  ;;  %518 = vmatpush1.msra.mxu1 %v355_v9  ;;  %v361_v18 = vld [vmem:[%s2096_s2] sm:$0xff]  ;;  %v366_v20 = vld [vmem:[%s2097_s3 + $0x8] sm:$0xff]  ;;  %v367_v22 = vld [vmem:[%s2097_s3 + $0x10] sm:$0xff]  ;;  %v595_v41 = vadd.s32 %v593_v37, %v588_v36  ;;  %v597_v42 = vadd.s32 %v593_v37, %v590_v38  ;;  %v596_v44 = vadd.s32 %v593_v37, %v589_v39  ;;  %v598_v48 = vmul.u32 32, %v594_v43  ;;  %s1442_s19 = sshll.u32 %s1646_s11, 5  ;;  %s1297_s11 = sshll.u32 %s2015_s26, 4  ;;  %s2037_s11 = int_to_ptr.vmem [resolvable:$true] %s1297_s11 }
  0x3e   : > { %430 = vmatprep.subr.mxu0 %v350_v10  ;;  %519 = vmatprep.subr.mxu1 %v352_v11  ;;  %v362_v21 = vld [vmem:[%s2096_s2 + $0x8] sm:$0xff]  ;;  %v365_v23 = vld [vmem:[%s2097_s3] sm:$0xff]  ;;  %v363_v24 = vld [vmem:[%s2096_s2 + $0x10] sm:$0xff]  ;;  %s1294_s13 = sadd.s32 %s1442_s19, %s1441_s0  ;;  %s2122_s23 = sld [smem:[#allocation14_spill]] }
  0x3f   : > { %431 = vmatpush1.msra.mxu0 %v349_v12  ;;  %520 = vmatpush1.msra.mxu1 %v351_v13  ;;  %v820_v25 = vld [vmem:[%s2099_s5 + $0x18] sm:$0xff]  ;;  %v819_v26 = vld [vmem:[%s2099_s5 + $0x10] sm:$0xff]  ;;  %v818_v28 = vld [vmem:[%s2099_s5 + $0x8] sm:$0xff]  ;;  %v599_v46 = vmul.u32 32, %v595_v41  ;;  %v601_v47 = vmul.u32 32, %v597_v42  ;;  %v614_v53 = vadd.s32 %v598_v48, %v585_v45  ;;  %v610_v58 = vadd.s32 %v598_v48, %v584_v50  ;;  %s1443_s10 = sshll.u32 %s1294_s13, 7 }
  0x40   : > { %432 = vmatprep.subr.mxu0 %v346_v14  ;;  %521 = vmatprep.subr.mxu1 %v348_v15  ;;  %v364_v27 = vld [vmem:[%s2096_s2 + $0x18] sm:$0xff]  ;;  %v817_v29 = vld [vmem:[%s2099_s5] sm:$0xff]  ;;  %v1052_v31 = vld [vmem:[%s2101_s7 + $0x8] sm:$0xff]  ;;  %v600_v49 = vmul.u32 32, %v596_v44  ;;  %s635_s20 = smul.u32 2246822519, %s634_s16  ;;  %v606_v11 = vadd.s32 %v598_v48, %v583_v59 }
  0x41   : > { %433 = vmatpush1.msra.mxu0 %v345_v16  ;;  %522 = vmatpush1.msra.mxu1 %v347_v17  ;;  %v1051_v30 = vld [vmem:[%s2101_s7] sm:$0xff]  ;;  %v1053_v32 = vld [vmem:[%s2101_s7 + $0x10] sm:$0xff]  ;;  %v1054_v33 = vld [vmem:[%s2101_s7 + $0x18] sm:$0xff]  ;;  %v615_v51 = vadd.s32 %v599_v46, %v585_v45  ;;  %v617_v52 = vadd.s32 %v601_v47, %v585_v45  ;;  %v611_v55 = vadd.s32 %v599_v46, %v584_v50  ;;  %v630_v62 = vmul.u32 2654435761, %v614_v53  ;;  %s1282_s18 = scalar_lea.sflag [#allocation5], %s1818_s28 }
  0x42   : > { %1398 = vmatmul.mubr.msk.f32.vlgmr.msra.gmra.mxu0 %vm389_vm0, %v361_v18  ;;  %1402 = vmatmul.mubr.msk.f32.vlgmr.msra.gmra.mxu1 %vm389_vm0, %v361_v18  ;;  %v616_v54 = vadd.s32 %v600_v49, %v585_v45  ;;  %v613_v56 = vadd.s32 %v601_v47, %v584_v50  ;;  %v636_v60 = vstv %s635_s20  ;;  %v612_v3 = vadd.s32 %v600_v49, %v584_v50  ;;  %s1562_s29 = scalar_lea.vmem %s2037_s11, 2048  ;;  %s1666_s16 = smov [#allocation6]  }
  0x43   : > { %472 = vmatprep.mubr.f32.mxu0 %v1664_v0  ;;  %561 = vmatprep.mubr.f32.mxu1 %v1664_v0  ;;  %v631_v57 = vmul.u32 2654435761, %v615_v51  ;;  %v633_v61 = vmul.u32 2654435761, %v617_v52  ;;  %v603_v4 = vadd.s32 %v599_v46, %v582_v40  ;;  %v607_v7 = vadd.s32 %v599_v46, %v583_v59  ;;  %p1563_p8 = scmp.ne.s32.totalorder %s2037_s11, %s1562_s29  ;;  %s1566_s20 = sshll.u32 %s1666_s16, 4  ;;  %s1567_s20 = int_to_ptr.vmem [resolvable:$false] %s1566_s20 }
  0x44   : > { %386 = vperm.xlu0 %1532, %v368_v19   ;;  %376 = vperm.xlu1 %1533, %v366_v20   ;;  %v632_v63 = vmul.u32 2654435761, %v616_v54  ;;  %v627_v1 = vmul.u32 2654435761, %v611_v55  ;;  %v609_v8 = vadd.s32 %v601_v47, %v583_v59  ;;  %v649_v10 = vxor.u32 %v636_v60, %v630_v62  ;;  %s2035_s24 = scalar_lea.hbm %s2122_s23, %s1443_s10  ;;  %s1568_s22 = scalar_lea.vmem %s1567_s20, 4096 }
  0x45   : > { %v629_v2 = vmul.u32 2654435761, %v613_v56  ;;  %v650_v5 = vxor.u32 %v636_v60, %v631_v57  ;;  %v626_v6 = vmul.u32 2654435761, %v610_v58  ;;  %v652_v9 = vxor.u32 %v636_v60, %v633_v61  ;;  %p1564_p0 = pnand %p1563_p8, %p1783_p9  ;;  %p1569_p4 = scmp.lt.s32.totalorder %s2037_s11, %s1567_s20 }
  0x46   : > { %1399 = vmatmul.mubr.msk.f32.gmra.mxu0 %vm389_vm0, %v362_v21  ;;  %1403 = vmatmul.mubr.msk.f32.gmra.mxu1 %vm389_vm0, %v362_v21  ;;  %v608_v12 = vadd.s32 %v600_v49, %v583_v59  ;;  %v651_v13 = vxor.u32 %v636_v60, %v632_v63  ;;  %v646_v14 = vxor.u32 %v636_v60, %v627_v1  ;;  %v628_v18 = vmul.u32 2654435761, %v612_v3  ;;  %p1570_p5 = scmp.lt.s32.totalorder %s1568_s22, %s1562_s29 }
  0x47   : > { %478 = vmatprep.mubr.f32.mxu0 %v1664_v0  ;;  %567 = vmatprep.mubr.f32.mxu1 %v1664_v0  ;;  %v605_v15 = vadd.s32 %v601_v47, %v582_v40  ;;  %v602_v16 = vadd.s32 %v598_v48, %v582_v40  ;;  %v648_v17 = vxor.u32 %v636_v60, %v629_v2  ;;  %v619_v19 = vmul.u32 2654435761, %v603_v4  ;;  %p1565_p1 = pneg %p1564_p0 }
  0x48   : > { %381 = vperm.xlu0 %1532, %v367_v22   ;;  %371 = vperm.xlu1 %1533, %v365_v23   ;;  %v604_v20 = vadd.s32 %v600_v49, %v582_v40  ;;  %v666_v21 = vshrl.u32 %v650_v5, 16  ;;  %v645_v22 = vxor.u32 %v636_v60, %v626_v6  ;;  %v623_v23 = vmul.u32 2654435761, %v607_v7  ;;  %p1571_p6 = por %p1570_p5, %p1569_p4 }
  0x49   : > { %v647_v34 = vxor.u32 %v636_v60, %v628_v18  ;;  %v638_v35 = vxor.u32 %v636_v60, %v619_v19 }
  0x4a   : > { %1400 = vmatmul.mubr.msk.f32.gmra.mxu0 %vm389_vm0, %v363_v24  ;;  %1404 = vmatmul.mubr.msk.f32.gmra.mxu1 %vm389_vm0, %v363_v24  ;;  %v625_v24 = vmul.u32 2654435761, %v609_v8  ;;  %v620_v36 = vmul.u32 2654435761, %v604_v20  ;;  %v682_v37 = vxor.u32 %v666_v21, %v650_v5  ;;  %v661_v38 = vshrl.u32 %v645_v22, 16  ;;  %p1572_p3 = pnand %p1571_p6, %p1565_p1 }
  0x4b   : > { %484 = vmatprep.mubr.f32.mxu0 %v1664_v0  ;;  %573 = vmatprep.mubr.f32.mxu1 %v1664_v0  ;;  %v642_v39 = vxor.u32 %v636_v60, %v623_v23  ;;  %v663_v50 = vshrl.u32 %v647_v34, 16  ;;  %v654_v51 = vshrl.u32 %v638_v35, 16 }
  0x4c   : > { %838 = vperm.xlu0 %1532, %v820_v25   ;;  %833 = vperm.xlu1 %1533, %v819_v26   ;;  %v668_v25 = vshrl.u32 %v652_v9, 16  ;;  %v665_v26 = vshrl.u32 %v649_v10, 16  ;;  %v644_v40 = vxor.u32 %v636_v60, %v625_v24  ;;  %v639_v52 = vxor.u32 %v636_v60, %v620_v36 }
  0x4d   : > { %v698_v53 = vmul.u32 2246822507, %v682_v37  ;;  %v677_v54 = vxor.u32 %v661_v38, %v645_v22  ;;  %v658_v55 = vshrl.u32 %v642_v39, 16  ;;  %v679_v4 = vxor.u32 %v663_v50, %v647_v34 }
  0x4e   : > { %1401 = vmatmul.mubr.msk.f32.gmra.mxu0 %vm389_vm0, %v364_v27  ;;  %1405 = vmatmul.mubr.msk.f32.gmra.mxu1 %vm389_vm0, %v364_v27  ;;  %v622_v27 = vmul.u32 2654435761, %v606_v11  ;;  %v684_v41 = vxor.u32 %v668_v25, %v652_v9  ;;  %v681_v42 = vxor.u32 %v665_v26, %v649_v10  ;;  %v660_v56 = vshrl.u32 %v644_v40, 16 }
  0x4f   : > { %917 = vmatprep.mubr.f32.mxu0 %v1664_v0  ;;  %1006 = vmatprep.mubr.f32.mxu1 %v1664_v0  ;;  %v670_v5 = vxor.u32 %v654_v51, %v638_v35  ;;  %v655_v6 = vshrl.u32 %v639_v52, 16  ;;  %v714_v7 = vshrl.u32 %v698_v53, 13  ;;  %v693_v8 = vmul.u32 2246822507, %v677_v54 }
  0x50   : > { %828 = vperm.xlu0 %1532, %v818_v28   ;;  %823 = vperm.xlu1 %1533, %v817_v29   ;;  %v624_v28 = vmul.u32 2654435761, %v608_v12  ;;  %v667_v29 = vshrl.u32 %v651_v13, 16  ;;  %v641_v43 = vxor.u32 %v636_v60, %v622_v27  ;;  %v700_v57 = vmul.u32 2246822507, %v684_v41 }
  0x51   : > { %v697_v58 = vmul.u32 2246822507, %v681_v42  ;;  %v674_v9 = vxor.u32 %v658_v55, %v642_v39  ;;  %v695_v19 = vmul.u32 2246822507, %v679_v4  ;;  %v671_v21 = vxor.u32 %v655_v6, %v639_v52 }
  0x52   : > { %v643_v44 = vxor.u32 %v636_v60, %v624_v28  ;;  %v683_v45 = vxor.u32 %v667_v29, %v651_v13  ;;  %v657_v59 = vshrl.u32 %v641_v43, 16  ;;  %v716_v10 = vshrl.u32 %v700_v57, 13 }
  0x53   : > { %v713_v11 = vshrl.u32 %v697_v58, 13  ;;  %v686_v20 = vmul.u32 2246822507, %v670_v5  ;;  %v730_v22 = vxor.u32 %v714_v7, %v698_v53  ;;  %v709_v23 = vshrl.u32 %v693_v8, 13 }
  0x54   : > { %1057 = vperm.xlu0 %1532, %v1051_v30   ;;  %1062 = vperm.xlu1 %1533, %v1052_v31   ;;  %v662_v30 = vshrl.u32 %v646_v14, 16  ;;  %v621_v31 = vmul.u32 2654435761, %v605_v15  ;;  %v659_v61 = vshrl.u32 %v643_v44, 16  ;;  %v699_v62 = vmul.u32 2246822507, %v683_v45 }
  0x55   : > { %v673_v12 = vxor.u32 %v657_v59, %v641_v43  ;;  %v690_v24 = vmul.u32 2246822507, %v674_v9  ;;  %v732_v26 = vxor.u32 %v716_v10, %v700_v57  ;;  %v729_v27 = vxor.u32 %v713_v11, %v697_v58 }
  0x56   : > { %v678_v46 = vxor.u32 %v662_v30, %v646_v14  ;;  %v640_v47 = vxor.u32 %v636_v60, %v621_v31  ;;  %v675_v13 = vxor.u32 %v659_v61, %v643_v44  ;;  %v715_v14 = vshrl.u32 %v699_v62, 13 }
  0x57   : > { %v689_v28 = vmul.u32 2246822507, %v673_v12  ;;  %v711_v35 = vshrl.u32 %v695_v19, 13  ;;  %v702_v36 = vshrl.u32 %v686_v20, 13  ;;  %v687_v37 = vmul.u32 2246822507, %v671_v21 }
  0x58   : > { %1067 = vperm.xlu0 %1532, %v1053_v32   ;;  %1072 = vperm.xlu1 %1533, %v1054_v33   ;;  %v618_v32 = vmul.u32 2654435761, %v602_v16  ;;  %v664_v33 = vshrl.u32 %v648_v17, 16  ;;  %v694_v63 = vmul.u32 2246822507, %v678_v46  ;;  %v656_v1 = vshrl.u32 %v640_v47, 16 }
  0x59   : > { %v691_v29 = vmul.u32 2246822507, %v675_v13  ;;  %v731_v30 = vxor.u32 %v715_v14, %v699_v62  ;;  %v746_v38 = vmul.u32 3266489909, %v730_v22  ;;  %v725_v39 = vxor.u32 %v709_v23, %v693_v8 }
  0x5a   : > { %v637_v48 = vxor.u32 %v636_v60, %v618_v32  ;;  %v680_v49 = vxor.u32 %v664_v33, %v648_v17  ;;  %v676_v60 = vxor.u32 %v660_v56, %v644_v40  ;;  %v710_v15 = vshrl.u32 %v694_v63, 13 }
  0x5b   : > { %v672_v16 = vxor.u32 %v656_v1, %v640_v47  ;;  %v706_v40 = vshrl.u32 %v690_v24, 13  ;;  %v748_v42 = vmul.u32 3266489909, %v732_v26  ;;  %v745_v43 = vmul.u32 3266489909, %v729_v27 }
  0x5c   : > { %v653_v2 = vshrl.u32 %v637_v48, 16  ;;  %v696_v3 = vmul.u32 2246822507, %v680_v49  ;;  %v692_v25 = vmul.u32 2246822507, %v676_v60  ;;  %v726_v31 = vxor.u32 %v710_v15, %v694_v63 }
  0x5d   : > { %v688_v32 = vmul.u32 2246822507, %v672_v16  ;;  %v705_v44 = vshrl.u32 %v689_v28, 13  ;;  %v707_v45 = vshrl.u32 %v691_v29, 13  ;;  %v1918_v53 = vxor.u32 %v711_v35, %v695_v19 }
  0x5e   : > { %v669_v17 = vxor.u32 %v653_v2, %v637_v48  ;;  %v712_v18 = vshrl.u32 %v696_v3, 13  ;;  %v708_v41 = vshrl.u32 %v692_v25, 13  ;;  %v747_v48 = vmul.u32 3266489909, %v731_v30 }
  0x5f   : > { %v742_v49 = vmul.u32 3266489909, %v726_v31  ;;  %v704_v50 = vshrl.u32 %v688_v32, 13  ;;  %v1920_v54 = vxor.u32 %v702_v36, %v686_v20  ;;  %v703_v55 = vshrl.u32 %v687_v37, 13 }
  0x60   : > { %v685_v33 = vmul.u32 2246822507, %v669_v17  ;;  %v728_v34 = vxor.u32 %v712_v18, %v696_v3  ;;  %v762_v58 = vshrl.u32 %v746_v38, 16  ;;  %v741_v59 = vmul.u32 3266489909, %v725_v39 }
  0x61   : > { %v722_v61 = vxor.u32 %v706_v40, %v690_v24  ;;  %v724_v62 = vxor.u32 %v708_v41, %v692_v25  ;;  %v764_v63 = vshrl.u32 %v748_v42, 16  ;;  %v761_v1 = vshrl.u32 %v745_v43, 16 }
  0x62   : > { %v701_v51 = vshrl.u32 %v685_v33, 13  ;;  %v744_v52 = vmul.u32 3266489909, %v728_v34  ;;  %v721_v2 = vxor.u32 %v705_v44, %v689_v28  ;;  %v723_v3 = vxor.u32 %v707_v45, %v691_v29 }
  0x63   : > { %v763_v6 = vshrl.u32 %v747_v48, 16  ;;  %v758_v7 = vshrl.u32 %v742_v49, 16  ;;  %v720_v8 = vxor.u32 %v704_v50, %v688_v32  ;;  %v743_v10 = vmul.u32 3266489909, %v1918_v53 }
  0x64   : > { %v717_v9 = vxor.u32 %v701_v51, %v685_v33  ;;  %v760_v60 = vshrl.u32 %v744_v52, 16  ;;  %v734_v11 = vmul.u32 3266489909, %v1920_v54  ;;  %v1932_v12 = vxor.u32 %v703_v55, %v687_v37 }
  0x65   : > { %v757_v15 = vshrl.u32 %v741_v59, 16  ;;  %v738_v16 = vmul.u32 3266489909, %v722_v61  ;;  %v740_v17 = vmul.u32 3266489909, %v724_v62  ;;  %v778_v18 = vxor.u32 %v762_v58, %v746_v38 }
  0x66   : > { %v780_v19 = vxor.u32 %v764_v63, %v748_v42  ;;  %v737_v20 = vmul.u32 3266489909, %v721_v2  ;;  %v739_v21 = vmul.u32 3266489909, %v723_v3  ;;  %v777_v24 = vxor.u32 %v761_v1, %v745_v43 }
  0x67   : > { %v779_v25 = vxor.u32 %v763_v6, %v747_v48  ;;  %v736_v26 = vmul.u32 3266489909, %v720_v8  ;;  %v733_v27 = vmul.u32 3266489909, %v717_v9  ;;  %v774_v29 = vxor.u32 %v758_v7, %v742_v49 }
  0x68   : > { %v776_v30 = vxor.u32 %v760_v60, %v744_v52  ;;  %v759_v31 = vshrl.u32 %v743_v10, 16  ;;  %v735_v32 = vmul.u32 3266489909, %v1932_v12  ;;  %v773_v35 = vxor.u32 %v757_v15, %v741_v59 }
  0x69   : > { %v754_v36 = vshrl.u32 %v738_v16, 16  ;;  %v756_v37 = vshrl.u32 %v740_v17, 16  ;;  %v750_v38 = vshrl.u32 %v734_v11, 16  ;;  %vm794_vm1 = vcmp.ge.u32.totalorder %v778_v18, 0 }
  0x6a   : > { %vm796_vm2 = vcmp.ge.u32.totalorder %v780_v19, 0  ;;  %v753_v39 = vshrl.u32 %v737_v20, 16  ;;  %v755_v40 = vshrl.u32 %v739_v21, 16  ;;  %vm793_vm3 = vcmp.ge.u32.totalorder %v777_v24, 0 }
  0x6b   : > { %vm795_vm4 = vcmp.ge.u32.totalorder %v779_v25, 0  ;;  %v752_v43 = vshrl.u32 %v736_v26, 16  ;;  %v749_v44 = vshrl.u32 %v733_v27, 16  ;;  %vm790_vm5 = vcmp.ge.u32.totalorder %v774_v29, 0 }
  0x6c   : > { %vm792_vm6 = vcmp.ge.u32.totalorder %v776_v30, 0  ;;  %v775_v48 = vxor.u32 %v759_v31, %v743_v10  ;;  %v751_v49 = vshrl.u32 %v735_v32, 16  ;;  %vm789_vm7 = vcmp.ge.u32.totalorder %v773_v35, 0 }
  0x6d   : > { %v770_v52 = vxor.u32 %v754_v36, %v738_v16  ;;  %v772_v53 = vxor.u32 %v756_v37, %v740_v17  ;;  %v766_v54 = vxor.u32 %v750_v38, %v734_v11  ;;  %v769_v59 = vxor.u32 %v753_v39, %v737_v20 }
  0x6e   : > { %v771_v61 = vxor.u32 %v755_v40, %v739_v21  ;;  %v768_v2 = vxor.u32 %v752_v43, %v736_v26  ;;  %v765_v3 = vxor.u32 %v749_v44, %v733_v27  ;;  %vm791_vm8 = vcmp.ge.u32.totalorder %v775_v48, 0 }
  0x6f   : > { %v767_v8 = vxor.u32 %v751_v49, %v735_v32  ;;  %vm786_vm9 = vcmp.ge.u32.totalorder %v770_v52, 0  ;;  %vm788_vm10 = vcmp.ge.u32.totalorder %v772_v53, 0  ;;  %vm785_vm11 = vcmp.ge.u32.totalorder %v769_v59, 0 }
  0x70   : > { %vm787_vm12 = vcmp.ge.u32.totalorder %v771_v61, 0  ;;  %vm782_vm13 = vcmp.ge.u32.totalorder %v766_v54, 0  ;;  %vm784_vm14 = vcmp.ge.u32.totalorder %v768_v2, 0  ;;  %vm781_vm15 = vcmp.ge.u32.totalorder %v765_v3, 0 }
  0xbf   : > { %v387_v28 = vpop.permute.xlu0 %386  ;;  %v377_v45 = vpop.permute.xlu1 %376 }
  0xc3   : > { %v382_v62 = vpop.permute.xlu0 %381  ;;  %v372_v10 = vpop.permute.xlu1 %371 }
  0xc7   : > { %v839_v27 = vpop.permute.xlu0 %838  ;;  %v834_v30 = vpop.permute.xlu1 %833 }
 0x102   : > { %v1914_v46 = vpop.f32.mrf.mxu0  ;;  %v1916_v47 = vpop.f32.mrf.mxu1 }
 0x104   : > { %v1922_v56 = vpop.f32.mrf.mxu0  ;;  %v1924_v57 = vpop.f32.mrf.mxu1 }
 0x106   : > { %v1926_v4 = vpop.f32.mrf.mxu0  ;;  %v1928_v5 = vpop.f32.mrf.mxu1 }
 0x107   : > { %v475_v15 = vadd.f32 %v1926_v4, %v377_v45  ;;  %v564_v16 = vadd.f32 %v1928_v5, %v377_v45  ;;  %v469_v4 = vadd.f32 %v1914_v46, %v372_v10  ;;  %v558_v5 = vadd.f32 %v1916_v47, %v372_v10  ;;  %v814_v46 = vld [vmem:[%s2098_s4 + $0x8] sm:$0xff]  ;;  %v815_v47 = vld [vmem:[%s2098_s4 + $0x10] sm:$0xff] }
 0x108   : > { %v1934_v13 = vpop.f32.mrf.mxu0  ;;  %v1936_v14 = vpop.f32.mrf.mxu1 }
 0x109   : > { %v477_v11 = vadd.f32 %v1934_v13, %v377_v45  ;;  %v566_v12 = vadd.f32 %v1936_v14, %v377_v45  ;;  %v471_v13 = vadd.f32 %v1922_v56, %v372_v10  ;;  %v560_v14 = vadd.f32 %v1924_v57, %v372_v10  ;;  %v813_v56 = vld [vmem:[%s2098_s4] sm:$0xff]  ;;  %v816_v57 = vld [vmem:[%s2098_s4 + $0x18] sm:$0xff] }
 0x10a   : > { %v480_v22 = vpop.f32.mrf.mxu0  ;;  %v569_v23 = vpop.f32.mrf.mxu1 }
 0x10b   : > { %v481_v9 = vadd.f32 %v480_v22, %v382_v62  ;;  %v570_v60 = vadd.f32 %v569_v23, %v382_v62 }
 0x10c   : > { %v482_v33 = vpop.f32.mrf.mxu0  ;;  %v571_v34 = vpop.f32.mrf.mxu1 }
 0x10d   : > { %v483_v6 = vadd.f32 %v482_v33, %v382_v62  ;;  %v572_v7 = vadd.f32 %v571_v34, %v382_v62 }
 0x10e   : > { %v486_v41 = vpop.f32.mrf.mxu0  ;;  %v575_v42 = vpop.f32.mrf.mxu1 }
 0x10f   : > { %v487_v63 = vadd.f32 %v486_v41, %v387_v28  ;;  %v576_v1 = vadd.f32 %v575_v42, %v387_v28  ;;  %v829_v41 = vpop.permute.xlu0 %828 }
 0x110   : > { %v488_v50 = vpop.f32.mrf.mxu0  ;;  %v577_v51 = vpop.f32.mrf.mxu1 }
 0x111   : > { %v489_v55 = vadd.f32 %v488_v50, %v387_v28  ;;  %v578_v58 = vadd.f32 %v577_v51, %v387_v28  ;;  %v824_v50 = vpop.permute.xlu1 %823 }
 0x113   : > { %1408 = vmatprep.subr.msk.mxu0 %vm794_vm1, %v489_v55  ;;  %1420 = vmatprep.subr.msk.mxu1 %vm796_vm2, %v578_v58  ;;  %vm783_vm1 = vcmp.ge.u32.totalorder %v767_v8, 0 }
 0x114   : > { %1409 = vmatpush1.msk.msra.mxu0 %vm793_vm3, %v487_v63  ;;  %1421 = vmatpush1.msk.msra.mxu1 %vm795_vm4, %v576_v1 }
 0x115   : > { %1410 = vmatprep.subr.msk.mxu0 %vm790_vm5, %v483_v6  ;;  %1422 = vmatprep.subr.msk.mxu1 %vm792_vm6, %v572_v7 }
 0x116   : > { %1411 = vmatpush1.msk.msra.mxu0 %vm789_vm7, %v481_v9  ;;  %1423 = vmatpush1.msk.msra.mxu1 %vm791_vm8, %v570_v60 }
 0x117   : > { %1412 = vmatprep.subr.msk.mxu0 %vm786_vm9, %v477_v11  ;;  %1424 = vmatprep.subr.msk.mxu1 %vm788_vm10, %v566_v12  ;;  %v1047_v12 = vld [vmem:[%s2100_s6] sm:$0xff] }
 0x118   : > { %1413 = vmatpush1.msk.msra.mxu0 %vm785_vm11, %v475_v15  ;;  %1425 = vmatpush1.msk.msra.mxu1 %vm787_vm12, %v564_v16  ;;  %v1048_v15 = vld [vmem:[%s2100_s6 + $0x8] sm:$0xff]  ;;  %v1049_v16 = vld [vmem:[%s2100_s6 + $0x10] sm:$0xff] }
 0x119   : > { %1414 = vmatprep.subr.msk.mxu0 %vm782_vm13, %v471_v13  ;;  %1426 = vmatprep.subr.msk.mxu1 %vm784_vm14, %v560_v14  ;;  %v1050_v13 = vld [vmem:[%s2100_s6 + $0x18] sm:$0xff]  ;;  %v1058_v14 = vpop.permute.xlu0 %1057 }
 0x11a   : > { %1415 = vmatpush1.msk.msra.mxu0 %vm781_vm15, %v469_v4  ;;  %1427 = vmatpush1.msk.msra.mxu1 %vm783_vm1, %v558_v5 }
 0x11b   : > { %1416 = vmatmul.mubr.msk.f32.vlgmr.msra.gmra.mxu0 %vm389_vm0, %v813_v56  ;;  %1428 = vmatmul.mubr.msk.f32.vlgmr.msra.gmra.mxu1 %vm389_vm0, %v813_v56 }
 0x11c   : > { %923 = vmatprep.mubr.f32.mxu0 %v1664_v0  ;;  %1012 = vmatprep.mubr.f32.mxu1 %v1664_v0 }
 0x11f   : > { %1417 = vmatmul.mubr.msk.f32.gmra.mxu0 %vm389_vm0, %v814_v46  ;;  %1429 = vmatmul.mubr.msk.f32.gmra.mxu1 %vm389_vm0, %v814_v46 }
 0x120   : > { %929 = vmatprep.mubr.f32.mxu0 %v1664_v0  ;;  %1018 = vmatprep.mubr.f32.mxu1 %v1664_v0 }
 0x123   : > { %1418 = vmatmul.mubr.msk.f32.gmra.mxu0 %vm389_vm0, %v815_v47  ;;  %1430 = vmatmul.mubr.msk.f32.gmra.mxu1 %vm389_vm0, %v815_v47 }
 0x124   : > { %935 = vmatprep.mubr.f32.mxu0 %v1664_v0  ;;  %1024 = vmatprep.mubr.f32.mxu1 %v1664_v0 }
 0x127   : > { %1419 = vmatmul.mubr.msk.f32.gmra.mxu0 %vm389_vm0, %v816_v57  ;;  %1431 = vmatmul.mubr.msk.f32.gmra.mxu1 %vm389_vm0, %v816_v57 }
 0x128   : > { %1151 = vmatprep.mubr.f32.mxu0 %v1664_v0  ;;  %1240 = vmatprep.mubr.f32.mxu1 %v1664_v0 }
 0x1db   : > { %v919_v17 = vpop.f32.mrf.mxu0  ;;  %v1008_v18 = vpop.f32.mrf.mxu1 }
 0x1dc   : > { %v920_v62 = vadd.f32 %v919_v17, %v824_v50  ;;  %v1009_v63 = vadd.f32 %v1008_v18, %v824_v50  ;;  %v1063_v17 = vpop.permute.xlu1 %1062 }
 0x1dd   : > { %v921_v19 = vpop.f32.mrf.mxu0  ;;  %v1010_v20 = vpop.f32.mrf.mxu1 }
 0x1de   : > { %v922_v55 = vadd.f32 %v921_v19, %v824_v50  ;;  %v1011_v58 = vadd.f32 %v1010_v20, %v824_v50  ;;  %v1031_v10 = vmax.f32 %v920_v62, 0.0  ;;  %v1033_v11 = vmax.f32 %v1009_v63, 0.0 }
 0x1df   : > { %v925_v21 = vpop.f32.mrf.mxu0  ;;  %v1014_v22 = vpop.f32.mrf.mxu1 }
 0x1e0   : > { %v926_v51 = vadd.f32 %v925_v21, %v829_v41  ;;  %v1015_v52 = vadd.f32 %v1014_v22, %v829_v41  ;;  %v1032_v9 = vmax.f32 %v922_v55, 0.0  ;;  %v1034_v60 = vmax.f32 %v1011_v58, 0.0 }
 0x1e1   : > { %v927_v23 = vpop.f32.mrf.mxu0  ;;  %v1016_v24 = vpop.f32.mrf.mxu1 }
 0x1e2   : > { %v928_v44 = vadd.f32 %v927_v23, %v829_v41  ;;  %v1017_v45 = vadd.f32 %v1016_v24, %v829_v41  ;;  %v1035_v7 = vmax.f32 %v926_v51, 0.0  ;;  %v1037_v8 = vmax.f32 %v1015_v52, 0.0 }
 0x1e3   : > { %v931_v25 = vpop.f32.mrf.mxu0  ;;  %v1020_v26 = vpop.f32.mrf.mxu1 }
 0x1e4   : > { %v932_v42 = vadd.f32 %v931_v25, %v834_v30  ;;  %v1021_v43 = vadd.f32 %v1020_v26, %v834_v30  ;;  %v1036_v3 = vmax.f32 %v928_v44, 0.0  ;;  %v1038_v6 = vmax.f32 %v1017_v45, 0.0  ;;  %v1068_v25 = vpop.permute.xlu0 %1067 }
 0x1e5   : > { %v933_v28 = vpop.f32.mrf.mxu0  ;;  %v1022_v29 = vpop.f32.mrf.mxu1 }
 0x1e6   : > { %v934_v37 = vadd.f32 %v933_v28, %v834_v30  ;;  %v1023_v38 = vadd.f32 %v1022_v29, %v834_v30  ;;  %v1039_v1 = vmax.f32 %v932_v42, 0.0  ;;  %v1041_v2 = vmax.f32 %v1021_v43, 0.0 }
 0x1e7   : > { %v937_v31 = vpop.f32.mrf.mxu0  ;;  %v1026_v32 = vpop.f32.mrf.mxu1 }
 0x1e8   : > { %v938_v33 = vadd.f32 %v937_v31, %v839_v27  ;;  %v1027_v34 = vadd.f32 %v1026_v32, %v839_v27  ;;  %v1040_v59 = vmax.f32 %v934_v37, 0.0  ;;  %v1042_v61 = vmax.f32 %v1023_v38, 0.0 }
 0x1e9   : > { %v939_v35 = vpop.f32.mrf.mxu0  ;;  %v1028_v36 = vpop.f32.mrf.mxu1 }
 0x1ea   : > { %v940_v39 = vadd.f32 %v939_v35, %v839_v27  ;;  %v1029_v40 = vadd.f32 %v1028_v36, %v839_v27  ;;  %v1043_v53 = vmax.f32 %v938_v33, 0.0  ;;  %v1045_v54 = vmax.f32 %v1027_v34, 0.0  ;;  %v1073_v34 = vpop.permute.xlu1 %1072 }
 0x1ec   : > { %v1044_v48 = vmax.f32 %v940_v39, 0.0  ;;  %v1046_v49 = vmax.f32 %v1029_v40, 0.0 }
 0x1ee   : > { %1111 = vmatprep.subr.mxu0 %v1044_v48  ;;  %1200 = vmatprep.subr.mxu1 %v1046_v49 }
 0x1ef   : > { %1112 = vmatpush1.msra.mxu0 %v1043_v53  ;;  %1201 = vmatpush1.msra.mxu1 %v1045_v54 }
 0x1f0   : > { %1113 = vmatprep.subr.mxu0 %v1040_v59  ;;  %1202 = vmatprep.subr.mxu1 %v1042_v61 }
 0x1f1   : > { %1114 = vmatpush1.msra.mxu0 %v1039_v1  ;;  %1203 = vmatpush1.msra.mxu1 %v1041_v2 }
 0x1f2   : > { %1115 = vmatprep.subr.mxu0 %v1036_v3  ;;  %1204 = vmatprep.subr.mxu1 %v1038_v6 }
 0x1f3   : > { %1116 = vmatpush1.msra.mxu0 %v1035_v7  ;;  %1205 = vmatpush1.msra.mxu1 %v1037_v8 }
 0x1f4   : > { %1117 = vmatprep.subr.mxu0 %v1032_v9  ;;  %1206 = vmatprep.subr.mxu1 %v1034_v60 }
 0x1f5   : > { %1118 = vmatpush1.msra.mxu0 %v1031_v10  ;;  %1207 = vmatpush1.msra.mxu1 %v1033_v11 }
 0x1f6   : > { %1432 = vmatmul.mubr.msk.f32.vlgmr.msra.gmra.mxu0 %vm389_vm0, %v1047_v12  ;;  %1436 = vmatmul.mubr.msk.f32.vlgmr.msra.gmra.mxu1 %vm389_vm0, %v1047_v12 }
 0x1f7   : > { %1157 = vmatprep.mubr.f32.mxu0 %v1664_v0  ;;  %1246 = vmatprep.mubr.f32.mxu1 %v1664_v0 }
 0x1fa   : > { %1433 = vmatmul.mubr.msk.f32.gmra.mxu0 %vm389_vm0, %v1048_v15  ;;  %1437 = vmatmul.mubr.msk.f32.gmra.mxu1 %vm389_vm0, %v1048_v15 }
 0x1fb   : > { %1163 = vmatprep.mubr.f32.mxu0 %v1664_v0  ;;  %1252 = vmatprep.mubr.f32.mxu1 %v1664_v0 }
 0x1fe   : > { %1434 = vmatmul.mubr.msk.f32.gmra.mxu0 %vm389_vm0, %v1049_v16  ;;  %1438 = vmatmul.mubr.msk.f32.gmra.mxu1 %vm389_vm0, %v1049_v16 }
 0x1ff   : > { %1169 = vmatprep.mubr.f32.mxu0 %v1664_v0  ;;  %1258 = vmatprep.mubr.f32.mxu1 %v1664_v0 }
 0x202   : > { %1435 = vmatmul.mubr.msk.f32.gmra.mxu0 %vm389_vm0, %v1050_v13  ;;  %1439 = vmatmul.mubr.msk.f32.gmra.mxu1 %vm389_vm0, %v1050_v13 }
 0x2b6   : > { %v1153_v4 = vpop.f32.mrf.mxu0  ;;  %v1242_v5 = vpop.f32.mrf.mxu1 }
 0x2b7   : > { %v1154_v56 = vadd.f32 %v1153_v4, %v1058_v14  ;;  %v1243_v46 = vadd.f32 %v1242_v5, %v1058_v14 }
 0x2b8   : > { %v1155_v47 = vpop.f32.mrf.mxu0  ;;  %v1244_v57 = vpop.f32.mrf.mxu1 }
 0x2b9   : > { %1265 = vst [vmem:[%s2015_s26] sm:$0xff] %v1154_v56  ;;  %1267 = vst [vmem:[%s2015_s26 + $0x10] sm:$0xff] %v1243_v46  ;;  %v1156_v0 = vadd.f32 %v1155_v47, %v1058_v14  ;;  %v1245_v18 = vadd.f32 %v1244_v57, %v1058_v14 }
 0x2ba   : > { %v1159_v19 = vpop.f32.mrf.mxu0  ;;  %v1248_v20 = vpop.f32.mrf.mxu1 }
 0x2bb   : > { %1266 = vst [vmem:[%s2015_s26 + $0x8] sm:$0xff] %v1156_v0  ;;  %1268 = vst [vmem:[%s2015_s26 + $0x18] sm:$0xff] %v1245_v18  ;;  %v1160_v21 = vadd.f32 %v1159_v19, %v1063_v17  ;;  %v1249_v22 = vadd.f32 %v1248_v20, %v1063_v17 }
 0x2bc   : > { %v1161_v23 = vpop.f32.mrf.mxu0  ;;  %v1250_v24 = vpop.f32.mrf.mxu1 }
 0x2bd   : > { %1269 = vst [vmem:[%s2015_s26 + $0x20] sm:$0xff] %v1160_v21  ;;  %1271 = vst [vmem:[%s2015_s26 + $0x30] sm:$0xff] %v1249_v22  ;;  %v1162_v26 = vadd.f32 %v1161_v23, %v1063_v17  ;;  %v1251_v27 = vadd.f32 %v1250_v24, %v1063_v17 }
 0x2be   : > { %v1165_v28 = vpop.f32.mrf.mxu0  ;;  %v1254_v29 = vpop.f32.mrf.mxu1 }
 0x2bf   : > { %1270 = vst [vmem:[%s2015_s26 + $0x28] sm:$0xff] %v1162_v26  ;;  %1272 = vst [vmem:[%s2015_s26 + $0x38] sm:$0xff] %v1251_v27  ;;  %v1166_v30 = vadd.f32 %v1165_v28, %v1068_v25  ;;  %v1255_v31 = vadd.f32 %v1254_v29, %v1068_v25 }
 0x2c0   : > { %v1167_v32 = vpop.f32.mrf.mxu0  ;;  %v1256_v33 = vpop.f32.mrf.mxu1 }
 0x2c1   : > { %1273 = vst [vmem:[%s2015_s26 + $0x40] sm:$0xff] %v1166_v30  ;;  %1275 = vst [vmem:[%s2015_s26 + $0x50] sm:$0xff] %v1255_v31  ;;  %v1168_v35 = vadd.f32 %v1167_v32, %v1068_v25  ;;  %v1257_v36 = vadd.f32 %v1256_v33, %v1068_v25 }
 0x2c2   : > { %v1171_v37 = vpop.f32.mrf.mxu0  ;;  %v1260_v38 = vpop.f32.mrf.mxu1 }
 0x2c3   : > { %1274 = vst [vmem:[%s2015_s26 + $0x48] sm:$0xff] %v1168_v35  ;;  %1276 = vst [vmem:[%s2015_s26 + $0x58] sm:$0xff] %v1257_v36  ;;  %v1172_v39 = vadd.f32 %v1171_v37, %v1073_v34  ;;  %v1261_v40 = vadd.f32 %v1260_v38, %v1073_v34 }
 0x2c4   : > { %v1173_v41 = vpop.f32.mrf.mxu0  ;;  %v1262_v42 = vpop.f32.mrf.mxu1 }
 0x2c5   : > { %1277 = vst [vmem:[%s2015_s26 + $0x60] sm:$0xff] %v1172_v39  ;;  %1279 = vst [vmem:[%s2015_s26 + $0x70] sm:$0xff] %v1261_v40  ;;  %v1174_v43 = vadd.f32 %v1173_v41, %v1073_v34  ;;  %v1263_v44 = vadd.f32 %v1262_v42, %v1073_v34 }
 0x2c7   : > { %1278 = vst [vmem:[%s2015_s26 + $0x68] sm:$0xff] %v1174_v43  ;;  %1280 = vst [vmem:[%s2015_s26 + $0x78] sm:$0xff] %v1263_v44 }
 0x2c8   : > { %1575 = shalt.err (!%p1572_p3)
}
 0x2c9   : > { %s1576_s17 = scalar_lea.hbm %s2035_s24, 2048  ;;  %s1580_s19 = scalar_lea.hbm %s2122_s23, 8192 }
 0x2ca   : > { %p1577_p7 = scmp.ne.s32.totalorder %s2035_s24, %s1576_s17  ;;  %p1581_p13 = scmp.lt.s32.totalorder %s2035_s24, %s2122_s23 }
 0x2cb   : > { %p1582_p2 = scmp.lt.s32.totalorder %s1580_s19, %s1576_s17 }
 0x2cc   : > { %p1578_p10 = pnand %p1577_p7, %p1783_p9 }
 0x2cd   : > { %p1583_p8 = por %p1582_p2, %p1581_p13 }
 0x2ce   : > { %p1579_p11 = pneg %p1578_p10 }
 0x2d0   : > { %p1584_p0 = pnand %p1583_p8, %p1579_p11 }
 0x2d2   : > { %1587 = shalt.err (!%p1584_p0)
}
 0x2d3   : > { %s1667_s21 = smov 512   ;;  %s1668_s15 = smov 1024  }
 0x2d4   : > { %s1669_s29 = smov 32  }
 0x2d5   : > { %1448 = dma.vmem_to_hbm [thread:$0]  (%p1783_p9), %s2037_s11, 2048, %s2035_s24, %s1282_s18, %s1667_s21, %s1668_s15, %s1669_s29  }
 0x2d6 PF: > { %s2123_s16 = sld [smem:[#allocation9_spill]]  ;;  %p1459_p1 = scmp.ge.s32.totalorder %s1658_s14, 2 }
 0x2d8   : > { %p1455_p4 = pnand %p1459_p1, %p1789_p12 }
 0x2da   : > { %p1456_p5 = pneg %p1455_p4 }
 0x2dc   : > { %s1312_s20 = sand.u32 1, %s2123_s16  }
 0x2dd   : > { %s1313_s22 = scalar_lea.sflag [#allocation5], %s1312_s20 }
 0x2de   : > { %1625 = dma.done.wait (%p1456_p5), %s1313_s22, 2048  }
 0x2df   : > { %1627 = vsyncadd (%p1456_p5), %s1313_s22, 4294965248  ;;  %s25_s14 = sadd.s32 1, %s1658_s14   ;;  %s2124_s11 = sld [smem:[#allocation10_spill]] }
 0x2e0   : > { %p22_p6 = scmp.ge.s32.totalorder %s25_s14, 6   ;;  %s2125_s28 = sld [smem:[#allocation11_spill]] }
 0x2e1   : > { %s2126_s13 = sld [smem:[#allocation12_spill]]  ;;  %s2127_s29 = smov %s1634_s30 }
 0x2e2   : > { %s2128_s30 = smov %s1638_s9  ;;  %s2129_s9 = smov %s1796_s27 }
 0x2e3   : > { %s2130_s10 = smov %s1650_s12  ;;  %24 = sbr.rel (!%p22_p6) target bundleno = 10 (0xa), region = 97 }
 0x2e6   : > { %s2131_s12 = smov %s2125_s28 }
 0x2e8   :  { %1318 = vsyncpa [#allocation4], 1 }
 0x2e9   :  { %1320 = vsyncpa [#allocation4 + $0x1], 1 }
 0x2ea   :  { %1321 = vsyncpa [#allocation5], 1 }
 0x2eb   :  { %1323 = vsyncpa [#allocation5 + $0x1], 1 }

</bundles_post_ra>
